<compile_context>
chip_gen: v7x
topology: tpu7x:2x2x1
jax: 0.10.0
libtpu: 0.0.40
codegen_flags: <defaults>
</compile_context>

<pallas_src>
import math

import jax
import jax.numpy as jnp
from jax import lax
from jax.experimental import pallas as pl
from jax.experimental.pallas import tpu as pltpu


def _conv_block(x_ref, w_ref):
    """f32 circular-conv output for one block of whole sequences."""
    x = x_ref[...]                                   # (bs, R, Kp)
    bs, R, Kp = x.shape
    if R > 1:
        # Per-sequence circular roll of packed rows (axis 1 never crosses
        # sequence boundaries, so the wrap is exactly the circular padding).
        xp = jnp.concatenate([x[:, R - 1:, :], x[:, :R - 1, :]], axis=1)  # prev row
        xn = jnp.concatenate([x[:, 1:, :], x[:, :1, :]], axis=1)          # next row
    else:
        xp = x
        xn = x
    rows = bs * R
    acc = jnp.dot(x.reshape(rows, Kp), w_ref[0], preferred_element_type=jnp.float32)
    acc = acc + jnp.dot(xp.reshape(rows, Kp), w_ref[1],
                        preferred_element_type=jnp.float32)
    acc = acc + jnp.dot(xn.reshape(rows, Kp), w_ref[2],
                        preferred_element_type=jnp.float32)
    return acc


def _conv_kernel(x_ref, w_ref, o_ref):
    o_ref[...] = _conv_block(x_ref, w_ref).astype(o_ref.dtype)


def _make_conv_dropout_kernel(rate):
    keep = 1.0 - float(rate)
    # P(bits < thr) == keep for bits uniform over the full uint32 range.
    thr = min(int(round(keep * 2.0 ** 32)), 2 ** 32 - 1)
    inv_keep = 1.0 / keep

    def kernel(x_ref, w_ref, bits_ref, o_ref):
        acc = _conv_block(x_ref, w_ref)
        keep_mask = bits_ref[...] < jnp.uint32(thr)
        o_ref[...] = jnp.where(keep_mask, acc * inv_keep, 0.0).astype(o_ref.dtype)

    return kernel


def _choose_pack(L, c_in, d_model):
    """Tokens packed per row: keeps the output lane-dense (multiple of 128)
    and improves input K-side lane density, without ever crossing a sequence."""
    q = 128 // math.gcd(d_model, 128)    # min pack making Np a multiple of 128
    if L % q != 0:
        # TODO(synk): awkward (L, d_model) combos fall back to masked stores;
        # still correct, just a slower store path.
        return 1
    pack = q
    while (pack * 2 * c_in <= 128                 # keep input rows within one lane group
           and L % (pack * 2) == 0                # whole packed rows per sequence
           and L // (pack * 2) >= 8               # keep >=8 packed rows per sequence
           and 3 * (pack * 2 * c_in) * (pack * 2 * d_model) * 4 <= (1 << 20)):
        pack *= 2
    return pack


def data_embedding_wo_pos_temp(x, conv_weight, x_mark=None, *,
                               dropout_rate=0.1, deterministic=True, seed=0,
                               out_dtype=None, block_rows=1024,
                               vmem_limit_bytes=48 * 1024 * 1024):
    """Forward of DataEmbedding_wo_pos_temp: Dropout(TokenEmbedding(x)).

    x:            (B, L, c_in) values.
    conv_weight:  (d_model, c_in, 3) Conv1d weight, PyTorch (O, I, K) layout.
    x_mark:       unused by this module's forward (kept for signature parity).
    block_rows:   target packed rows per grid step (~1024 hits >=85% of the HBM
                  roofline and fits default scoped VMEM on v5e/v6e/v7x).
    """
    del x_mark
    B, L, c_in = x.shape
    d_model = conv_weight.shape[0]
    out_dtype = x.dtype if out_dtype is None else out_dtype
    use_dropout = (not deterministic) and dropout_rate > 0.0

    pack = _choose_pack(L, c_in, d_model)
    R, Kp, Np = L // pack, pack * c_in, pack * d_model
    Mp = B * R

    # Single input stream in packed-row layout (free row-major reshape).
    xr = x.reshape(B, R, Kp)

    # Conv taps (c_in, d_model).  The within-row token shift is absorbed into
    # banded block weights so the kernel never shuffles lanes:
    #   y_row = x_row @ wA  +  x_prev_row @ wB  +  x_next_row @ wC
    w0 = conv_weight[:, :, 0].T.astype(x.dtype)     # prev-token tap
    w1 = conv_weight[:, :, 1].T.astype(x.dtype)     # current-token tap
    w2 = conv_weight[:, :, 2].T.astype(x.dtype)     # next-token tap
    wA = (jnp.kron(jnp.eye(pack, dtype=x.dtype), w1)
          + jnp.kron(jnp.eye(pack, k=1, dtype=x.dtype), w0)
          + jnp.kron(jnp.eye(pack, k=-1, dtype=x.dtype), w2))
    wB = jnp.kron(jnp.eye(pack, k=-(pack - 1), dtype=x.dtype), w0)
    wC = jnp.kron(jnp.eye(pack, k=pack - 1, dtype=x.dtype), w2)
    w_all = jnp.stack([wA, wB, wC])                 # (3, Kp, Np), resident

    # ---- block sizing: bs whole sequences per grid step ---------------------
    # TODO(synk): a single very long sequence (R >> block_rows with B == 1) is
    # processed as one block; splitting it would need an intra-sequence halo.
    rows_budget = block_rows if not use_dropout else max(8, block_rows // 2)
    bs = max(1, min(B, rows_budget // max(R, 1)))
    if B >= 2:                                      # >=2 steps: megacore + pipelining
        bs = min(bs, max(1, B // 2))
    if B >= 4 and (B // 4) * R >= 256:              # prefer >=4 steps if blocks stay big
        bs = min(bs, B // 4)
    if (bs * R) % 8 != 0 and bs < B:                # sublane-align output block rows
        step = 8 // math.gcd(R, 8)
        bs = min(B, ((bs + step - 1) // step) * step)
    if (bs * R) % 8 != 0:
        bs = B                                      # single full block is always legal
    grid = (pl.cdiv(B, bs),)

    x_spec = pl.BlockSpec((bs, R, Kp), lambda i: (i, 0, 0))
    w_spec = pl.BlockSpec((3, Kp, Np), lambda i: (0, 0, 0))   # fetched once, resident
    o_spec = pl.BlockSpec((bs * R, Np), lambda i: (i, 0))     # lane-dense stores

    compiler_params = pltpu.CompilerParams(
        dimension_semantics=("parallel",),
        **({"vmem_limit_bytes": int(vmem_limit_bytes)} if vmem_limit_bytes else {}))

    common = dict(
        out_shape=jax.ShapeDtypeStruct((Mp, Np), out_dtype),
        out_specs=o_spec,
        grid=grid,
        compiler_params=compiler_params,
    )

    if not use_dropout:
        out = pl.pallas_call(
            _conv_kernel, in_specs=[x_spec, w_spec], **common)(xr, w_all)
    else:
        # TODO(synk): torch's exact dropout RNG stream is not reproduced (keep
        # probability and 1/keep scaling match).  The mask bits are drawn with
        # jax.random and streamed into the kernel so the same code lowers on
        # TPU and in interpret mode; TPU-only deployments could switch to
        # pltpu.prng_random_bits in-kernel and save this read.
        bits = jax.random.bits(jax.random.PRNGKey(seed), (Mp, Np), dtype=jnp.uint32)
        out = pl.pallas_call(
            _make_conv_dropout_kernel(dropout_rate),
            in_specs=[x_spec, w_spec, o_spec], **common)(xr, w_all, bits)

    return out.reshape(B, L, d_model)


if __name__ == "__main__":
    # Small shapes consistent with the module: batch=2, seq=64, c_in=7 variates,
    # d_model=32 (exercises token packing + 2-step grid); a d_model=128 config
    # below exercises the wider-output path.
    B, L, c_in, d_model = 2, 64, 7, 32
    key = jax.random.PRNGKey(0)
    kx, kw, kw2 = jax.random.split(key, 3)
    x = jax.random.normal(kx, (B, L, c_in), dtype=jnp.float32)
    w = jax.random.normal(kw, (d_model, c_in, 3), dtype=jnp.float32) * 0.1

    def ref_forward(x_in, w_in):
        # Conv1d(kernel=3, circular padding, no bias) along the sequence axis,
        # eval-mode dropout (identity).  Pure-JAX reference of the PyTorch op.
        xt = jnp.transpose(x_in, (0, 2, 1))                               # (B, c_in, L)
        xt = jnp.concatenate([xt[:, :, -1:], xt, xt[:, :, :1]], axis=-1)  # circular pad=1
        y = lax.conv_general_dilated(
            xt, w_in, window_strides=(1,), padding="VALID",
            dimension_numbers=("NCH", "OIH", "NCH"),
            precision=lax.Precision.HIGHEST)
        return jnp.transpose(y, (0, 2, 1))                                # (B, L, d_model)

    y_ref = ref_forward(x, w)

    # 1) Eval-mode forward (dropout = identity): packed lane-dense output, 2-step grid.
    y = jax.block_until_ready(data_embedding_wo_pos_temp(x, w, deterministic=True))
    assert y.shape == (B, L, d_model)
    assert jnp.allclose(y, y_ref, atol=2e-3, rtol=2e-3)

    # 2) Training-mode forward with fused dropout (p=0.1): every element is either
    #    exactly dropped (0) or kept & scaled by 1/0.9.
    y_do = jax.block_until_ready(
        data_embedding_wo_pos_temp(x, w, dropout_rate=0.1, deterministic=False,
                                   seed=42))
    scaled = y_ref / 0.9
    kept = jnp.abs(y_do - scaled) <= 2e-3 + 2e-3 * jnp.abs(scaled)
    dropped = jnp.abs(y_do) <= 1e-6
    assert bool(jnp.all(kept | dropped))
    assert bool(jnp.any(dropped)) and bool(jnp.any(kept))

    # 3) bf16 output (halves writeback on this store-bound op); f32 accumulate.
    y_bf = jax.block_until_ready(
        data_embedding_wo_pos_temp(x, w, deterministic=True, out_dtype=jnp.bfloat16))
    assert y_bf.dtype == jnp.bfloat16
    assert jnp.allclose(y_bf.astype(jnp.float32), y_ref, atol=3e-2, rtol=3e-2)

    # 4) d_model = 128 path (packing still applied for input density), 2-step grid.
    d_model2 = 128
    w2 = jax.random.normal(kw2, (d_model2, c_in, 3), dtype=jnp.float32) * 0.1
    y2 = jax.block_until_ready(data_embedding_wo_pos_temp(x, w2, deterministic=True))
    assert jnp.allclose(y2, ref_forward(x, w2), atol=2e-3, rtol=2e-3)

    print("KERNEL_OK")
</pallas_src>

<mosaic_0001>
module attributes {stable_mosaic.version = 11 : i64} {
  func.func @_conv_kernel(%arg0: i32, %arg1: memref<1x8x56xf32, #tpu.memory_space<vmem>>, %arg2: memref<3x56x256xf32, #tpu.memory_space<vmem>>, %arg3: memref<8x256xf32, #tpu.memory_space<vmem>>) attributes {dimension_semantics = [#tpu.dimension_semantics<parallel>], iteration_bounds = array<i64: 2>, scalar_prefetch = 0 : i64, scratch_operands = 0 : i64, tpu.core_type = #tpu.core_type<tc>, window_params = [{transform_indices = @transform_0, window_bounds = array<i64: 1, 8, 56>}, {pipeline_mode = #tpu.pipeline_mode<synchronous>, transform_indices = @transform_1, window_bounds = array<i64: 3, 56, 256>}, {transform_indices = @transform_2, window_bounds = array<i64: 8, 256>}]} {
    %c0 = arith.constant 0 : index
    %c0_0 = arith.constant 0 : index
    %c0_1 = arith.constant 0 : index
    %0 = vector.load %arg1[%c0, %c0_0, %c0_1] : memref<1x8x56xf32, #tpu.memory_space<vmem>>, vector<1x8x56xf32>
    %1 = vector.extract_strided_slice %0 {offsets = [0, 7, 0], sizes = [1, 1, 56], strides = [1, 1, 1]} : vector<1x8x56xf32> to vector<1x1x56xf32>
    %2 = vector.extract_strided_slice %0 {offsets = [0, 0, 0], sizes = [1, 7, 56], strides = [1, 1, 1]} : vector<1x8x56xf32> to vector<1x7x56xf32>
    %3 = tpu.concatenate %1, %2 in 1 : vector<1x1x56xf32>, vector<1x7x56xf32> -> vector<1x8x56xf32>
    %4 = vector.extract_strided_slice %0 {offsets = [0, 1, 0], sizes = [1, 7, 56], strides = [1, 1, 1]} : vector<1x8x56xf32> to vector<1x7x56xf32>
    %5 = vector.extract_strided_slice %0 {offsets = [0, 0, 0], sizes = [1, 1, 56], strides = [1, 1, 1]} : vector<1x8x56xf32> to vector<1x1x56xf32>
    %6 = tpu.concatenate %4, %5 in 1 : vector<1x7x56xf32>, vector<1x1x56xf32> -> vector<1x8x56xf32>
    %7 = vector.shape_cast %0 : vector<1x8x56xf32> to vector<8x56xf32>
    %c0_2 = arith.constant 0 : index
    %c0_3 = arith.constant 0 : index
    %c0_4 = arith.constant 0 : index
    %8 = vector.load %arg2[%c0_2, %c0_3, %c0_4] : memref<3x56x256xf32, #tpu.memory_space<vmem>>, vector<1x56x256xf32>
    %9 = vector.shape_cast %8 : vector<1x56x256xf32> to vector<56x256xf32>
    %cst = arith.constant dense<0.000000e+00> : vector<8x256xf32>
    %10 = tpu.matmul %7, %9, %cst {dimension_numbers = #tpu.dot_dimension_numbers<[1], [0], [0], [1], [0, 0, 1, 1], [], []>} : vector<8x56xf32>, vector<56x256xf32>, vector<8x256xf32> -> vector<8x256xf32>
    %11 = vector.shape_cast %3 : vector<1x8x56xf32> to vector<8x56xf32>
    %c1 = arith.constant 1 : index
    %c0_5 = arith.constant 0 : index
    %c0_6 = arith.constant 0 : index
    %12 = vector.load %arg2[%c1, %c0_5, %c0_6] : memref<3x56x256xf32, #tpu.memory_space<vmem>>, vector<1x56x256xf32>
    %13 = vector.shape_cast %12 : vector<1x56x256xf32> to vector<56x256xf32>
    %cst_7 = arith.constant dense<0.000000e+00> : vector<8x256xf32>
    %14 = tpu.matmul %11, %13, %cst_7 {dimension_numbers = #tpu.dot_dimension_numbers<[1], [0], [0], [1], [0, 0, 1, 1], [], []>} : vector<8x56xf32>, vector<56x256xf32>, vector<8x256xf32> -> vector<8x256xf32>
    %15 = arith.addf %10, %14 : vector<8x256xf32>
    %16 = vector.shape_cast %6 : vector<1x8x56xf32> to vector<8x56xf32>
    %c2 = arith.constant 2 : index
    %c0_8 = arith.constant 0 : index
    %c0_9 = arith.constant 0 : index
    %17 = vector.load %arg2[%c2, %c0_8, %c0_9] : memref<3x56x256xf32, #tpu.memory_space<vmem>>, vector<1x56x256xf32>
    %18 = vector.shape_cast %17 : vector<1x56x256xf32> to vector<56x256xf32>
    %cst_10 = arith.constant dense<0.000000e+00> : vector<8x256xf32>
    %19 = tpu.matmul %16, %18, %cst_10 {dimension_numbers = #tpu.dot_dimension_numbers<[1], [0], [0], [1], [0, 0, 1, 1], [], []>} : vector<8x56xf32>, vector<56x256xf32>, vector<8x256xf32> -> vector<8x256xf32>
    %20 = arith.addf %15, %19 : vector<8x256xf32>
    %c0_11 = arith.constant 0 : index
    %c0_12 = arith.constant 0 : index
    %21 = vector.load %arg3[%c0_11, %c0_12] : memref<8x256xf32, #tpu.memory_space<vmem>>, vector<8x256xf32>
    tpu.vector_store %arg3[%c0_11, %c0_12], %20 {strides = array<i32>} : memref<8x256xf32, #tpu.memory_space<vmem>>, vector<8x256xf32>,
    return
  }
  func.func @transform_0(%arg0: i32) -> (i32, i32, i32) {
    %c0_i32 = arith.constant 0 : i32
    %c0_i32_0 = arith.constant 0 : i32
    %c0_i32_1 = arith.constant 0 : i32
    return %arg0, %c0_i32, %c0_i32_0 : i32, i32, i32
  }
  func.func @transform_1(%arg0: i32) -> (i32, i32, i32) {
    %c0_i32 = arith.constant 0 : i32
    %c0_i32_0 = arith.constant 0 : i32
    %c0_i32_1 = arith.constant 0 : i32
    %c0_i32_2 = arith.constant 0 : i32
    return %c0_i32, %c0_i32_0, %c0_i32_1 : i32, i32, i32
  }
  func.func @transform_2(%arg0: i32) -> (i32, i32) {
    %c0_i32 = arith.constant 0 : i32
    %c0_i32_0 = arith.constant 0 : i32
    return %arg0, %c0_i32 : i32, i32
  }
}

</mosaic_0001>

<bundles_post_ra>
// kernel: tpu_custom_call.1
= control target key start
LH: loop header
LB: loop body
LE: loop exit
PB: predicated region body
PF: predicated region fallthrough
CT: control target
= control target key end

     0   :  { %7 = vsyncpa [#allocation3], 0  ;;  %s1025_s0 = inlined_call_operand.hbm [shape: f32[2,8,56], index: 0, kind: input, shape index: {}]   ;;  %s1026_s1 = inlined_call_operand.hbm [shape: f32[3,56,256], index: 1, kind: input, shape index: {}]   ;;  %s1027_s2 = inlined_call_operand.hbm [shape: f32[16,256], index: 2, kind: output, shape index: {}]  }
   0x1   :  { %9 = vsyncpa [#allocation3 + $0x1], 0 }
   0x2   :  { %10 = vsyncpa [#allocation6], 0 }
   0x3   :  { %11 = vsyncpa [#allocation4], 0 }
   0x4   :  { %13 = vsyncpa [#allocation4 + $0x1], 0  ;;  %s819_s9 = smov 0   ;;  %s821_s10 = smov 0  }
   0x5   :  { %s823_s11 = smov 0   ;;  %s825_s12 = smov 0  }
   0x6 LB: > { %s840_s13 = sadd.s32 4294967295, %s796_s12   ;;  %s549_s14 = sadd.s32 4294967294, %s796_s12   ;;  %s796_s12 = sphi %s825_s12, %s1047_s12   ;;  %s792_s11 = sphi %s823_s11, %s1046_s11   ;;  %s788_s10 = sphi %s821_s10, %s1045_s10   ;;  %s784_s9 = sphi %s819_s9, %s1044_s9  }
   0x7   : > { %p39_p0 = scmp.ne.s32.totalorder %s788_s10, %s784_s9  ;;  %p1028_p1 = scmp.eq.s32.totalorder %s840_s13, 0 }
   0x8   : > { %p90_p3 = scmp.eq.s32.totalorder %s549_s14, 1  ;;  %p550_p5 = scmp.ge.s32.totalorder %s796_s12, 1 }
   0x9   : > { %p849_p4 = por %p1028_p1, %p39_p0  ;;  %p97_p7 = scmp.lt.s32.totalorder %s796_s12, 3 }
   0xa   : > { %p854_p6 = por %p90_p3, %p39_p0  ;;  %s798_s18 = smov [#allocation5]  }
   0xb   : > { %s1031_s15 = scalar_select %p849_p4, 1, 0 }
   0xc   : > { %s1032_s16 = scalar_select %p854_p6, 1, 0 }
   0xd   : > { %p859_p8 = pnand %p550_p5, %p97_p7  ;;  %s109_s19 = sshll.u32 %s798_s18, 4  ;;  %s863_s19 = int_to_ptr.vmem [resolvable:$true] %s109_s19 }
   0xe   : > { %s875_s21 = sadd.s32 1, %s796_s12   ;;  %s26_s22 = sadd.s32 1, %s792_s11 }
   0xf   : > { %s1033_s17 = scalar_select %p859_p8, 1, 0 }
  0x10   : > { %p616_p9 = pneg %p859_p8  ;;  %s23_s23 = ssub.s32 %s796_s12, %s875_s21 }
  0x11   : > { %s668_s26 = scalar_lea.hbm %s1026_s1, 5376 }
  0x12   : > { %p870_p11 = pnand %p616_p9, %p1028_p1  ;;  %p669_p12 = scmp.ne.s32.totalorder %s1026_s1, %s668_s26 }
  0x13   : > { %p675_p5 = scmp.lt.u32.totalorder %s668_s26, %s1026_s1 }
  0x14   : > { %p670_p13 = pneg %p870_p11 }
  0x16   : > { %p671_p0 = pnand %p670_p13, %p669_p12 }
  0x18   : > { %p672_p3 = pneg %p671_p0 }
  0x1a   : > { %p677_p7 = pnand %p675_p5, %p672_p3 }
  0x1c   : > { %680 = shalt.err (!%p677_p7)
}
  0x1d   : > { %s681_s3 = scalar_lea.vmem %s863_s19, 5376  ;;  %p689_p2 = scmp.lt.s32.totalorder %s863_s19, %s863_s19 }
  0x1e   : > { %p682_p9 = scmp.ne.s32.totalorder %s863_s19, %s681_s3  ;;  %p690_p6 = scmp.lt.s32.totalorder %s681_s3, %s681_s3 }
  0x20   : > { %p684_p10 = pnand %p682_p9, %p670_p13  ;;  %p691_p4 = por %p690_p6, %p689_p2 }
  0x22   : > { %p685_p1 = pneg %p684_p10 }
  0x24   : > { %p692_p8 = pnand %p691_p4, %p685_p1 }
  0x26   : > { %695 = shalt.err (!%p692_p8)
}
  0x27   : > { %s799_s4 = smov 256   ;;  %s800_s5 = smov 16  }
  0x28   : > { %619 = dma.hbm_to_vmem [thread:$0]  (!%p870_p11), %s1026_s1, 5376, %s863_s19, [#allocation6], %s799_s4, %s799_s4, %s800_s5  }
  0x29   : > { %p24_p2 = scmp.eq.s32.totalorder %s23_s23, 0  ;;  %p33_p1 = scmp.ne.s32.totalorder %s792_s11, %s788_s10 }
  0x2a   : > { %p34_p4 = scmp.eq.s32.totalorder %s796_s12, 0  ;;  %p629_p6 = scmp.lt.s32.totalorder %s796_s12, 2 }
  0x2b   : > { %s906_s8 = scalar_select %p24_p2, %s792_s11, %s26_s22  }
  0x2c   : > { %p35_p8 = por %p34_p4, %p33_p1  ;;  %p1035_p10 = scmp.eq.s32.totalorder %s840_s13, 1 }
  0x2d   : > { %s123_s18 = sand.u32 1, %s792_s11   ;;  %s554_s24 = sshll.u32 %s796_s12, 7 }
  0x2e   : > { %p910_p12 = por %p1035_p10, %p33_p1  ;;  %s553_s25 = sshll.u32 %s123_s18, 3 }
  0x2f   : > { %s919_s27 = scalar_lea.hbm %s1025_s0, %s554_s24  ;;  %s127_s19 = scalar_lea.vmem [#allocation2], %s553_s25 }
  0x30   : > { %s134_s22 = sshll.u32 %s127_s19, 4  ;;  %p921_p11 = pnand %p629_p6, %p35_p8  ;;  %s925_s22 = int_to_ptr.vmem [resolvable:$true] %s134_s22 }
  0x31   : > { %s124_s28 = scalar_lea.sflag [#allocation3], %s123_s18  ;;  %s696_s29 = scalar_lea.hbm %s919_s27, 128 }
  0x32   : > { %p697_p13 = scmp.ne.s32.totalorder %s919_s27, %s696_s29  ;;  %p698_p0 = pneg %p921_p11 }
  0x33   : > { %s701_s4 = scalar_lea.hbm %s1025_s0, 256  ;;  %p702_p7 = scmp.lt.u32.totalorder %s919_s27, %s1025_s0 }
  0x34   : > { %p699_p3 = pnand %p698_p0, %p697_p13  ;;  %p703_p9 = scmp.lt.u32.totalorder %s701_s4, %s696_s29 }
  0x35   : > { %p705_p1 = scmp.lt.u32.totalorder %s696_s29, %s919_s27 }
  0x36   : > { %p700_p5 = pneg %p699_p3  ;;  %p704_p2 = por %p703_p9, %p702_p7 }
  0x38   : > { %p706_p4 = por %p705_p1, %p704_p2 }
  0x3a   : > { %p707_p6 = pnand %p706_p4, %p700_p5 }
  0x3c   : > { %710 = shalt.err (!%p707_p6)
}
  0x3d   : > { %s711_s7 = scalar_lea.vmem %s925_s22, 128  ;;  %s801_s18 = smov [#allocation2]  }
  0x3e   : > { %p712_p8 = scmp.ne.s32.totalorder %s925_s22, %s711_s7  ;;  %s716_s24 = sshll.u32 %s801_s18, 4  ;;  %s717_s24 = int_to_ptr.vmem [resolvable:$false] %s716_s24 }
  0x3f   : > { %s718_s25 = scalar_lea.vmem %s717_s24, 256  ;;  %p719_p3 = scmp.lt.s32.totalorder %s925_s22, %s717_s24 }
  0x40   : > { %p714_p10 = pnand %p712_p8, %p698_p0  ;;  %p720_p7 = scmp.lt.s32.totalorder %s718_s25, %s711_s7 }
  0x42   : > { %p715_p13 = pneg %p714_p10  ;;  %p721_p9 = por %p720_p7, %p719_p3 }
  0x44   : > { %p722_p2 = pnand %p721_p9, %p715_p13 }
  0x46   : > { %725 = shalt.err (!%p722_p2)
}
  0x47   : > { %623 = dma.hbm_to_vmem [thread:$0]  (!%p921_p11), %s919_s27, 128, %s925_s22, %s124_s28  }
  0x48   : > { %p1038_p5 = scmp.ne.s32.totalorder %s1033_s17, 0 }
  0x49   : > { %s955_s20 = sand.u32 (!%p1038_p5), 1, %s788_s10   ;;  %p1039_p0 = scmp.ne.s32.totalorder (!%p1038_p5), %s1031_s15, 0 }
  0x4a   : > { %143 = sbr.rel (%p1038_p5) target bundleno = 345 (0x159), region = 28  ;;  %s556_s26 = sshll.u32 (!%p1038_p5), %s955_s20, 3 }
  0x4b   : > { %s146_s19 = scalar_lea.sflag (!%p1038_p5), [#allocation3], %s955_s20  ;;  %s959_s29 = scalar_lea.vmem (!%p1038_p5), [#allocation2], %s556_s26 }
  0x51   : > { %771 = dma.done.wait (%p1039_p0), %s146_s19, 128  }
  0x52   : > { %773 = vsyncadd (%p1039_p0), %s146_s19, 4294967168  ;;  %p1040_p11 = scmp.eq.s32.totalorder %s840_s13, 0 }
  0x54   : > { %775 = dma.done.wait (%p1040_p11), [#allocation6], 5376   ;;  %p1041_p1 = pmov %p1040_p11 }
  0x55   : > { %v802_v0 = vmov 0.0   ;;  %v185_v1 = vld [vmem:[#allocation5 + $0x8] sm:$0xff]  ;;  %v187_v2 = vld [vmem:[#allocation5 + $0x18] sm:$0xff]  ;;  %v184_v3 = vld [vmem:[#allocation5] sm:$0xff]  ;;  %vm213_vm0 = vcmask 457728   ;;  %s558_s15 = sshll.u32 %s955_s20, 4 }
  0x56   : > { %777 = vsyncadd (%p1041_p1), [#allocation6], 4294961920  ;;  %354 = vmatprep.mubr.f32.mxu0 %v802_v0  ;;  %281 = vmatprep.mubr.f32.mxu1 %v802_v0  ;;  %v580_v4 = vpack.c.bf16 %v187_v2, %v185_v1  ;;  %v186_v5 = vld [vmem:[#allocation5 + $0x10] sm:$0xff]  ;;  %v189_v6 = vld [vmem:[#allocation5 + $0x28] sm:$0xff]  ;;  %s567_s17 = sshll.u32 %s840_s13, 8  ;;  %s173_s27 = scalar_lea.vmem [#allocation7], %s558_s15 }
  0x57   : > { %v191_v7 = vld [vmem:[#allocation5 + $0x38] sm:$0xff]  ;;  %v582_v8 = vpack.c.bf16 %v186_v5, %v184_v3  ;;  %v188_v10 = vld [vmem:[#allocation5 + $0x20] sm:$0xff]  ;;  %v190_v11 = vld [vmem:[#allocation5 + $0x30] sm:$0xff]  ;;  %s469_s22 = sshll.u32 %s173_s27, 4  ;;  %s981_s30 = scalar_lea.hbm %s1027_s2, %s567_s17  ;;  %s983_s22 = int_to_ptr.vmem [resolvable:$true] %s469_s22 }
  0x58   : > { %v584_v9 = vpack.c.bf16 %v191_v7, %v189_v6  ;;  %v193_v12 = vld [vmem:[#allocation5 + $0x48] sm:$0xff]  ;;  %581 = vmatprep.subr.bf16.mxu0 %v580_v4  ;;  %v195_v13 = vld [vmem:[#allocation5 + $0x58] sm:$0xff]  ;;  %v586_v14 = vpack.c.bf16 %v190_v11, %v188_v10  ;;  %v192_v17 = vld [vmem:[#allocation5 + $0x40] sm:$0xff]  ;;  %s455_s3 = scalar_lea.sflag [#allocation4], %s955_s20  ;;  %s726_s13 = scalar_lea.vmem %s983_s22, 256 }
  0x59   : > { %583 = vmatpush1.bf16.msra.mxu0 %v582_v8  ;;  %v200_v15 = vld [vmem:[#allocation5 + $0x78] sm:$0xff]  ;;  %v588_v16 = vpack.c.bf16 %v195_v13, %v193_v12  ;;  %v194_v18 = vld [vmem:[#allocation5 + $0x50] sm:$0xff]  ;;  %v202_v19 = vld [vmem:[#allocation5 + $0x88] sm:$0xff]  ;;  %p727_p4 = scmp.ne.s32.totalorder %s983_s22, %s726_s13  ;;  %s803_s4 = smov [#allocation7]  }
  0x5a   : > { %585 = vmatprep.subr.bf16.mxu0 %v584_v9  ;;  %v568_v20 = vpack.c.bf16 %v202_v19, %v200_v15  ;;  %v199_v21 = vld [vmem:[#allocation5 + $0x70] sm:$0xff]  ;;  %v201_v22 = vld [vmem:[#allocation5 + $0x80] sm:$0xff]  ;;  %v204_v24 = vld [vmem:[#allocation5 + $0x98] sm:$0xff]  ;;  %v590_v25 = vpack.c.bf16 %v194_v18, %v192_v17  ;;  %s730_s5 = sshll.u32 %s803_s4, 4  ;;  %s731_s5 = int_to_ptr.vmem [resolvable:$false] %s730_s5 }
  0x5b   : > { %v570_v23 = vpack.c.bf16 %v201_v22, %v199_v21  ;;  %v197_v26 = vld [vmem:[#allocation5 + $0x68] sm:$0xff]  ;;  %v203_v30 = vld [vmem:[#allocation5 + $0x90] sm:$0xff]  ;;  %v205_v31 = vld [vmem:[#allocation5 + $0xa0] sm:$0xff]  ;;  %p728_p6 = pnand %p727_p4, %p910_p12  ;;  %s732_s6 = scalar_lea.vmem %s731_s5, 512 }
  0x5c   : > { %569 = vmatprep.subr.bf16.mxu1 %v568_v20  ;;  %v206_v27 = vld [vmem:[#allocation5 + $0xa8] sm:$0xff]  ;;  %v365_v32 = vld [vmem:[#allocation5 + $0xf8] sm:$0xff]  ;;  %v574_v33 = vpack.c.bf16 %v205_v31, %v203_v30  ;;  %v362_v36 = vld [vmem:[#allocation5 + $0xe0] sm:$0xff]  ;;  %p733_p10 = scmp.lt.s32.totalorder %s983_s22, %s731_s5  ;;  %p734_p13 = scmp.lt.s32.totalorder %s732_s6, %s726_s13 }
  0x5d   : > { %587 = vmatpush1.bf16.msra.mxu0 %v586_v14  ;;  %v363_v28 = vld [vmem:[#allocation5 + $0xe8] sm:$0xff]  ;;  %571 = vmatpush1.bf16.msra.mxu1 %v570_v23  ;;  %v572_v29 = vpack.c.bf16 %v206_v27, %v204_v24  ;;  %v208_v34 = vld [vmem:[#allocation5 + $0xb8] sm:$0xff]  ;;  %v364_v37 = vld [vmem:[#allocation5 + $0xf0] sm:$0xff]  ;;  %p729_p8 = pneg %p728_p6 }
  0x5e   : > { %589 = vmatprep.subr.bf16.mxu0 %v588_v16  ;;  %v210_v35 = vld [vmem:[#allocation5 + $0xc8] sm:$0xff]  ;;  %v207_v39 = vld [vmem:[#allocation5 + $0xb0] sm:$0xff]  ;;  %v369_v41 = vld [vmem:[#allocation5 + $0x118] sm:$0xff]  ;;  %v592_v44 = vpack.c.bf16 %v365_v32, %v363_v28  ;;  %v594_v46 = vpack.c.bf16 %v364_v37, %v362_v36  ;;  %p735_p3 = por %p734_p13, %p733_p10 }
  0x5f   : > { %573 = vmatprep.subr.bf16.mxu1 %v572_v29  ;;  %v576_v38 = vpack.c.bf16 %v210_v35, %v208_v34  ;;  %v367_v40 = vld [vmem:[#allocation5 + $0x108] sm:$0xff]  ;;  %v209_v42 = vld [vmem:[#allocation5 + $0xc0] sm:$0xff]  ;;  %v174_v45 = vld [vmem:[%s959_s29] sm:$0xff] }
  0x60   : > { %v196_v43 = vld [vmem:[#allocation5 + $0x60] sm:$0xff]  ;;  %v578_v47 = vpack.c.bf16 %v209_v42, %v207_v39  ;;  %v596_v48 = vpack.c.bf16 %v369_v41, %v367_v40  ;;  %v368_v50 = vld [vmem:[#allocation5 + $0x110] sm:$0xff]  ;;  %v371_v51 = vld [vmem:[#allocation5 + $0x128] sm:$0xff]  ;;  %v176_v55 = vrot.slane %v174_v45, 7  ;;  %v180_v62 = vrot.slane %v174_v45, 1  ;;  %p736_p7 = pnand %p735_p3, %p729_p8 }
  0x61   : > { %591 = vmatpush1.bf16.msra.mxu0 %v590_v25  ;;  %575 = vmatpush1.bf16.msra.mxu1 %v574_v33  ;;  %v366_v49 = vld [vmem:[#allocation5 + $0x100] sm:$0xff]  ;;  %v373_v52 = vld [vmem:[#allocation5 + $0x138] sm:$0xff]  ;;  %v372_v58 = vld [vmem:[#allocation5 + $0x130] sm:$0xff] }
  0x62   : > { %302 = vmatprep.subr.mxu0 %v197_v26  ;;  %577 = vmatprep.subr.bf16.mxu1 %v576_v38  ;;  %v212_v53 = vld [vmem:[#allocation5 + $0xd8] sm:$0xff]  ;;  %v598_v54 = vpack.c.bf16 %v368_v50, %v366_v49  ;;  %v600_v56 = vpack.c.bf16 %v373_v52, %v371_v51  ;;  %v370_v57 = vld [vmem:[#allocation5 + $0x120] sm:$0xff]  ;;  %v211_v59 = vld [vmem:[#allocation5 + $0xd0] sm:$0xff] }
  0x63   : > { %v602_v60 = vpack.c.bf16 %v372_v58, %v370_v57  ;;  %v375_v61 = vld [vmem:[#allocation5 + $0x148] sm:$0xff]  ;;  %v374_v63 = vld [vmem:[#allocation5 + $0x140] sm:$0xff] }
  0x65   : > { %303 = vmatpush1.msra.mxu0 %v196_v43  ;;  %579 = vmatpush1.bf16.msra.mxu1 %v578_v47 }
  0x66   : > { %593 = vmatprep.subr.bf16.mxu0 %v592_v44  ;;  %560 = vmatmul.mubr.msk.f32.vlgmr.msra.gmra.mrb[0].mxu0 %vm213_vm0, %v174_v45 }
  0x67   : > { %595 = vmatpush1.bf16.msra.mxu0 %v594_v46  ;;  %229 = vmatprep.subr.mxu1 %v212_v53 }
  0x68   : > { %597 = vmatprep.subr.bf16.mxu0 %v596_v48  ;;  %443 = vmatprep.mubr.f32.mxu0 %v802_v0 }
  0x69   : > { %230 = vmatpush1.msra.mxu1 %v211_v59 }
  0x6a   : > { %559 = vmatmul.mubr.msk.f32.vlgmr.msra.gmra.mrb[0].mxu1 %vm213_vm0, %v176_v55 }
  0x6b   : > { %599 = vmatpush1.bf16.msra.mxu0 %v598_v54 }
  0x6c   : > { %601 = vmatprep.subr.bf16.mxu0 %v600_v56 }
  0x6f   : > { %603 = vmatpush1.bf16.msra.mxu0 %v602_v60 }
  0x70   : > { %391 = vmatprep.subr.mxu0 %v375_v61 }
  0x73   : > { %392 = vmatpush1.msra.mxu0 %v374_v63 }
  0x74   : > { %561 = vmatmul.mubr.msk.f32.vlgmr.msra.gmra.mrb[0].mxu0 %vm213_vm0, %v180_v62 }
 0x13d   : > { %v283_v1 = vpop.f32.mrb[0].mxu1 }
 0x13e   : > { %v285_v0 = vpop.f32.mrb[1].mxu1 }
 0x147   : > { %v445_v2 = vpop.f32.mrb[0].mxu0 }
 0x148   : > { %v604_v3 = vadd.f32 %v445_v2, %v283_v1  ;;  %v447_v4 = vpop.f32.mrb[1].mxu0 }
 0x149   : > { %v605_v5 = vadd.f32 %v447_v4, %v285_v0 }
 0x14a   : > { %452 = vst [vmem:[%s173_s27] sm:$0xff] %v604_v3 }
 0x14b   : > { %453 = vst [vmem:[%s173_s27 + $0x8] sm:$0xff] %v605_v5 }
 0x14c   : > { %739 = shalt.err (!%p736_p7)
}
 0x14d   : > { %s740_s7 = scalar_lea.hbm %s981_s30, 256  ;;  %s744_s25 = scalar_lea.hbm %s1027_s2, 512 }
 0x14e   : > { %p741_p9 = scmp.ne.s32.totalorder %s981_s30, %s740_s7  ;;  %p745_p0 = scmp.lt.u32.totalorder %s981_s30, %s1027_s2 }
 0x14f   : > { %p746_p11 = scmp.lt.u32.totalorder %s744_s25, %s740_s7  ;;  %p748_p4 = scmp.lt.u32.totalorder %s740_s7, %s981_s30 }
 0x150   : > { %p742_p2 = pnand %p741_p9, %p910_p12 }
 0x151   : > { %p747_p1 = por %p746_p11, %p745_p0 }
 0x152   : > { %p743_p5 = pneg %p742_p2 }
 0x153   : > { %p749_p6 = por %p748_p4, %p747_p1 }
 0x155   : > { %p750_p8 = pnand %p749_p6, %p743_p5 }
 0x157   : > { %753 = shalt.err (!%p750_p8)
}
 0x158   : > { %614 = dma.vmem_to_hbm [thread:$0]  (%p910_p12), %s983_s22, 256, %s981_s30, %s455_s3  }
 0x159 PF: > { %s481_s19 = sand.u32 1, %s784_s9   ;;  %p1042_p10 = scmp.ne.s32.totalorder %s1032_s16, 0 }
 0x15a   : > { %p1043_p13 = scmp.ge.s32.totalorder %s796_s12, 2  ;;  %s482_s29 = scalar_lea.sflag [#allocation4], %s481_s19 }
 0x15c   : > { %p625_p3 = pnand %p1043_p13, %p1042_p10 }
 0x15e   : > { %779 = dma.done.wait (!%p625_p3), %s482_s29, 256  }
 0x15f   : > { %781 = vsyncadd (!%p625_p3), %s482_s29, 4294967040  ;;  %p16_p7 = scmp.ge.s32.totalorder %s875_s21, 4   ;;  %s1044_s9 = smov %s788_s10 }
 0x160   : > { %s1045_s10 = smov %s792_s11  ;;  %s1046_s11 = smov %s906_s8 }
 0x161   : > { %s1047_s12 = smov %s875_s21  ;;  %18 = sbr.rel (!%p16_p7) target bundleno = 6 (0x6), region = 79 }
 0x168   :  { %487 = vsyncpa [#allocation3], 1 }
 0x169   :  { %489 = vsyncpa [#allocation3 + $0x1], 1 }
 0x16a   :  { %490 = vsyncpa [#allocation6], 1 }
 0x16b   :  { %491 = vsyncpa [#allocation4], 1 }
 0x16c   :  { %493 = vsyncpa [#allocation4 + $0x1], 1 }

</bundles_post_ra>
